<compile_context>
chip_gen: v6e
topology: v6e:2x2x1
jax: 0.10.0
libtpu: 0.0.40
codegen_flags: <defaults>
</compile_context>

<pallas_src>
import functools

import jax
import jax.numpy as jnp
import numpy as np
from jax import lax
from jax.experimental import pallas as pl
from jax.experimental.pallas import tpu as pltpu

_LANE = 128   # lane width
_SUB = 8      # sublane height


def _round_up(x, m):
    return ((x + m - 1) // m) * m


# ----------------------------------------------------------------------------
# GAE kernel
# ----------------------------------------------------------------------------
def _gae_kernel(v_s_ref, v_sn_ref, rew_ref, end_ref, adv_ref, gae_ref,
                *, gamma, gae_lambda):
    # Grid: (episode-lane tiles [parallel], time tiles [arbitrary, reversed]).
    # gae_ref: (1, LANES) running GAE carry, persists across time tiles.
    @pl.when(pl.program_id(1) == 0)
    def _():
        gae_ref[...] = jnp.zeros_like(gae_ref)

    TT, _ = adv_ref.shape
    num_chunks = TT // _SUB
    gl = gamma * gae_lambda

    def chunk_step(chunk, gae):
        base = chunk * _SUB
        if not isinstance(base, int):
            base = pl.multiple_of(base, _SUB)
        # Compute delta / discount on the fly for this (8, LANES) chunk.
        delta = (rew_ref[pl.ds(base, _SUB), :]
                 + gamma * v_sn_ref[pl.ds(base, _SUB), :]
                 - v_s_ref[pl.ds(base, _SUB), :])
        disc = (1.0 - end_ref[pl.ds(base, _SUB), :]) * gl
        rows = [None] * _SUB
        g = gae
        for r in range(_SUB - 1, -1, -1):        # 8-step recurrence, unrolled
            g = delta[r:r + 1, :] + disc[r:r + 1, :] * g
            rows[r] = g
        adv_ref[pl.ds(base, _SUB), :] = jnp.concatenate(rows, axis=0)
        return g

    gae = gae_ref[...]
    if num_chunks <= 8:                          # small tile: full unroll
        for c in range(num_chunks):
            gae = chunk_step(num_chunks - 1 - c, gae)
    else:
        gae = lax.fori_loop(
            0, num_chunks,
            lambda c, g: chunk_step(num_chunks - 1 - c, g), gae)
    gae_ref[...] = gae


def gae_return(v_s, v_s_, rew, end_flag, gamma=0.99, gae_lambda=0.95):
    """Pallas equivalent of _gae_return.

    Accepts either a single episode (T,) or a batch of E independent episodes
    (E, T); episodes are packed across the 128-lane dimension.
    """
    v_s = jnp.asarray(v_s, jnp.float32)
    v_s_ = jnp.asarray(v_s_, jnp.float32)
    rew = jnp.asarray(rew, jnp.float32)
    end_flag = jnp.asarray(end_flag, jnp.float32)

    squeeze = rew.ndim == 1
    if squeeze:
        v_s, v_s_, rew, end_flag = (x[None, :] for x in
                                    (v_s, v_s_, rew, end_flag))
    E, T = rew.shape

    # Time tile (multiple of 8 sublanes); cap so large T pipelines through a
    # grid axis instead of one giant VMEM block (v7x has only 64 MiB VMEM).
    Tp0 = _round_up(T, _SUB)
    TT = min(Tp0, 512)
    Tp = _round_up(T, TT)
    # Lane tile over episodes.
    LB = 512 if E >= 512 else _LANE
    Ep = _round_up(E, LB)

    def prep(x):
        # (E, T) -> pad -> (Tp, Ep): time on sublanes, episodes on lanes.
        # Trailing-time padding is zeros => delta = 0 there, so the backward
        # scan carry entering the real episode is exactly 0 (correct).
        x = jnp.pad(x, ((0, Ep - E), (0, Tp - T)))
        return x.T

    args = tuple(prep(x) for x in (v_s, v_s_, rew, end_flag))
    ne, nt = Ep // LB, Tp // TT

    kernel = functools.partial(_gae_kernel, gamma=float(gamma),
                               gae_lambda=float(gae_lambda))
    # Time blocks are processed last-first (reversed index_map) so the serial
    # backward scan can carry gae across grid steps in VMEM scratch.
    spec = pl.BlockSpec((TT, LB), lambda e, t: (nt - 1 - t, e))

    out = pl.pallas_call(
        kernel,
        out_shape=jax.ShapeDtypeStruct((Tp, Ep), jnp.float32),
        grid=(ne, nt),
        in_specs=[spec] * 4,
        out_specs=spec,
        scratch_shapes=[pltpu.VMEM((1, LB), jnp.float32)],
        compiler_params=pltpu.CompilerParams(
            dimension_semantics=("parallel", "arbitrary")),
    )(*args)

    adv = out[:T, :E].T
    return adv[0] if squeeze else adv


# ----------------------------------------------------------------------------
# n-step return kernel (lane-dense: bsz on lanes)
# ----------------------------------------------------------------------------
def _nstep_kernel(rew_ref, end_ref, tq_ref, out_ref, *, gamma, n_step):
    # rew_ref / end_ref : (nrows, LB)  rows 0..n_step-1 valid, bsz on lanes
    # tq_ref / out_ref  : (drows, LB)  rows 0..d-1 valid,      bsz on lanes
    L = out_ref.shape[1]
    returns = jnp.zeros((1, L), jnp.float32)
    gammas = jnp.full((1, L), float(n_step), jnp.float32)

    for n in range(n_step - 1, -1, -1):          # static small loop
        done = end_ref[n:n + 1, :] > 0.0
        gammas = jnp.where(done, float(n + 1), gammas)
        returns = jnp.where(done, 0.0, returns)
        returns = rew_ref[n:n + 1, :] + gamma * returns

    # gamma ** gammas built by repeated multiplication (matches reference)
    gpow = jnp.ones((1, L), jnp.float32)
    for i in range(1, n_step + 1):
        gpow = jnp.where(gammas >= float(i), gpow * gamma, gpow)

    out_ref[...] = tq_ref[...] * gpow + returns


def nstep_return(rew_gathered, end_gathered, target_q, gamma=0.99, n_step=1):
    rew_g = jnp.asarray(rew_gathered, jnp.float32)   # (bsz, n_step)
    end_g = jnp.asarray(end_gathered, jnp.float32)   # (bsz, n_step)
    tq = jnp.asarray(target_q, jnp.float32)          # (bsz, d)
    bsz, d = tq.shape
    n = int(n_step)

    LB = 512 if bsz >= 512 else _LANE
    Bp = _round_up(bsz, LB)
    nrows = _round_up(n, _SUB)
    drows = _round_up(d, _SUB)

    def prep(x, rows):
        # (bsz, cols) -> (rows, Bp): lane-dense, bsz on lanes.
        x = x.T
        return jnp.pad(x, ((0, rows - x.shape[0]), (0, Bp - bsz)))

    rew_t = prep(rew_g, nrows)
    end_t = prep(end_g, nrows)
    tq_t = prep(tq, drows)

    nb = Bp // LB
    kernel = functools.partial(_nstep_kernel, gamma=float(gamma), n_step=n)
    out = pl.pallas_call(
        kernel,
        out_shape=jax.ShapeDtypeStruct((drows, Bp), jnp.float32),
        grid=(nb,),
        in_specs=[pl.BlockSpec((nrows, LB), lambda b: (0, b)),
                  pl.BlockSpec((nrows, LB), lambda b: (0, b)),
                  pl.BlockSpec((drows, LB), lambda b: (0, b))],
        out_specs=pl.BlockSpec((drows, LB), lambda b: (0, b)),
        compiler_params=pltpu.CompilerParams(
            dimension_semantics=("parallel",)),
    )(rew_t, end_t, tq_t)
    return out[:d, :bsz].T


# ----------------------------------------------------------------------------
# numpy reference implementations (ports of the njit functions, for checking)
# ----------------------------------------------------------------------------
def _gae_return_np(v_s, v_s_, rew, end_flag, gamma, gae_lambda):
    returns = np.zeros(rew.shape, dtype=np.float32)
    delta = rew + v_s_ * gamma - v_s
    discount = (1.0 - end_flag) * (gamma * gae_lambda)
    gae = 0.0
    for i in range(len(rew) - 1, -1, -1):
        gae = delta[i] + discount[i] * gae
        returns[i] = gae
    return returns


def _nstep_return_np(rew, end_flag, target_q, indices, gamma, n_step):
    gamma_buffer = np.ones(n_step + 1, dtype=np.float32)
    for i in range(1, n_step + 1):
        gamma_buffer[i] = gamma_buffer[i - 1] * gamma
    target_shape = target_q.shape
    bsz = target_shape[0]
    target_q = target_q.reshape(bsz, -1).copy()
    returns = np.zeros(target_q.shape, dtype=np.float32)
    gammas = np.full(indices[0].shape, n_step)
    for n in range(n_step - 1, -1, -1):
        now = indices[n]
        gammas[end_flag[now] > 0] = n + 1
        returns[end_flag[now] > 0] = 0.0
        returns = rew[now].reshape(bsz, 1) + gamma * returns
    target_q = target_q * gamma_buffer[gammas].reshape(bsz, 1) + returns
    return target_q.reshape(target_shape)


# ----------------------------------------------------------------------------
# main
# ----------------------------------------------------------------------------
if __name__ == "__main__":
    key = jax.random.PRNGKey(0)
    k1, k2, k3, k4 = jax.random.split(key, 4)

    # -------- GAE: E=4 episodes of length T=16 packed across lanes --------
    E, T = 4, 16
    gamma, gae_lambda = 0.99, 0.95
    rew = jax.random.normal(k1, (E, T), jnp.float32)
    v_s_ = jax.random.normal(k2, (E, T), jnp.float32)
    v_s = jnp.roll(v_s_, 1, axis=1)
    end_np = np.zeros((E, T), dtype=np.float32)
    end_np[:, T - 1] = 1.0
    end_np[0, 7] = 1.0
    end_np[2, 3] = 1.0
    end_flag = jnp.asarray(end_np)

    adv = jax.block_until_ready(
        gae_return(v_s, v_s_, rew, end_flag, gamma, gae_lambda))
    for e in range(E):
        adv_ref = _gae_return_np(np.asarray(v_s)[e], np.asarray(v_s_)[e],
                                 np.asarray(rew)[e], end_np[e],
                                 gamma, gae_lambda)
        assert np.allclose(np.asarray(adv)[e], adv_ref, rtol=1e-4, atol=1e-4), \
            f"GAE kernel mismatch (episode {e})"

    # single 1-D episode path (same signature as the reference njit function)
    adv1 = jax.block_until_ready(
        gae_return(v_s[0], v_s_[0], rew[0], end_flag[0], gamma, gae_lambda))
    adv1_ref = _gae_return_np(np.asarray(v_s)[0], np.asarray(v_s_)[0],
                              np.asarray(rew)[0], end_np[0],
                              gamma, gae_lambda)
    assert np.allclose(np.asarray(adv1), adv1_ref, rtol=1e-4, atol=1e-4), \
        "GAE kernel mismatch (1-D episode)"

    # -------- n-step return: bsz=8, n_step=3, buffer_len=32, d=4 --------
    buf_len, bsz, n_step, d = 32, 8, 3, 4
    gamma_ns = 0.99
    rew_buf = np.asarray(jax.random.normal(k3, (buf_len,), jnp.float32))
    done_buf = np.zeros((buf_len,), dtype=np.float32)
    done_buf[[5, 11, 20, 31]] = 1.0

    # glue: build n-step index chains (buffer.next: stop advancing at done)
    idx0 = np.arange(0, bsz * 3, 3)
    indices = [idx0]
    for _ in range(n_step - 1):
        prev = indices[-1]
        nxt = np.where(done_buf[prev] > 0, prev,
                       np.minimum(prev + 1, buf_len - 1))
        indices.append(nxt)
    indices = np.stack(indices)                           # (n_step, bsz)
    terminal = indices[-1]

    target_q = np.asarray(jax.random.normal(k4, (bsz, d), jnp.float32))
    value_mask = (1.0 - done_buf[terminal]).reshape(-1, 1)  # ~terminated
    target_q_masked = (target_q * value_mask).astype(np.float32)

    rew_g = rew_buf[indices].T                             # (bsz, n_step)
    end_g = done_buf[indices].T                            # (bsz, n_step)

    returns = jax.block_until_ready(
        nstep_return(rew_g, end_g, target_q_masked, gamma_ns, n_step))

    returns_ref = _nstep_return_np(rew_buf, done_buf, target_q_masked.copy(),
                                   indices, gamma_ns, n_step)
    assert np.allclose(np.asarray(returns), returns_ref,
                       rtol=1e-4, atol=1e-4), "n-step return kernel mismatch"

    print("KERNEL_OK")
</pallas_src>

<mosaic_0001>
module attributes {stable_mosaic.version = 11 : i64} {
  func.func @_gae_kernel(%arg0: i32, %arg1: i32, %arg2: memref<16x128xf32, #tpu.memory_space<vmem>>, %arg3: memref<16x128xf32, #tpu.memory_space<vmem>>, %arg4: memref<16x128xf32, #tpu.memory_space<vmem>>, %arg5: memref<16x128xf32, #tpu.memory_space<vmem>>, %arg6: memref<16x128xf32, #tpu.memory_space<vmem>>, %arg7: memref<1x128xf32, #tpu.memory_space<vmem>>) attributes {dimension_semantics = [#tpu.dimension_semantics<parallel>, #tpu.dimension_semantics<arbitrary>], iteration_bounds = array<i64: 1, 1>, scalar_prefetch = 0 : i64, scratch_operands = 1 : i64, tpu.core_type = #tpu.core_type<tc>, window_params = [{transform_indices = @transform_0, window_bounds = array<i64: 16, 128>}, {transform_indices = @transform_1, window_bounds = array<i64: 16, 128>}, {transform_indices = @transform_2, window_bounds = array<i64: 16, 128>}, {transform_indices = @transform_3, window_bounds = array<i64: 16, 128>}, {transform_indices = @transform_4, window_bounds = array<i64: 16, 128>}]} {
    %c0_i32 = arith.constant 0 : i32
    %0 = arith.cmpi eq, %arg1, %c0_i32 : i32
    %1 = arith.extui %0 : i1 to i32
    %c0_i32_0 = arith.constant 0 : i32
    %2 = arith.cmpi ne, %1, %c0_i32_0 : i32
    scf.if %2 {
      %cst_28 = arith.constant 0.000000e+00 : f32
      %97 = vector.broadcast %cst_28 : f32 to vector<1x128xf32>
      %c0_29 = arith.constant 0 : index
      %c0_30 = arith.constant 0 : index
      %98 = vector.load %arg7[%c0_29, %c0_30] : memref<1x128xf32, #tpu.memory_space<vmem>>, vector<1x128xf32>
      tpu.vector_store %arg7[%c0_29, %c0_30], %97 {strides = array<i32>} : memref<1x128xf32, #tpu.memory_space<vmem>>, vector<1x128xf32>,
    } else {
    }
    %c0 = arith.constant 0 : index
    %c0_1 = arith.constant 0 : index
    %3 = vector.load %arg7[%c0, %c0_1] : memref<1x128xf32, #tpu.memory_space<vmem>>, vector<1x128xf32>
    %c8 = arith.constant 8 : index
    %c0_2 = arith.constant 0 : index
    %4 = vector.load %arg4[%c8, %c0_2] : memref<16x128xf32, #tpu.memory_space<vmem>>, vector<8x128xf32>
    %c8_3 = arith.constant 8 : index
    %c0_4 = arith.constant 0 : index
    %5 = vector.load %arg3[%c8_3, %c0_4] : memref<16x128xf32, #tpu.memory_space<vmem>>, vector<8x128xf32>
    %cst = arith.constant 9.900000e-01 : f32
    %6 = vector.broadcast %cst : f32 to vector<8x128xf32>
    %7 = arith.mulf %6, %5 : vector<8x128xf32>
    %8 = arith.addf %4, %7 : vector<8x128xf32>
    %c8_5 = arith.constant 8 : index
    %c0_6 = arith.constant 0 : index
    %9 = vector.load %arg2[%c8_5, %c0_6] : memref<16x128xf32, #tpu.memory_space<vmem>>, vector<8x128xf32>
    %10 = arith.subf %8, %9 : vector<8x128xf32>
    %c8_7 = arith.constant 8 : index
    %c0_8 = arith.constant 0 : index
    %11 = vector.load %arg5[%c8_7, %c0_8] : memref<16x128xf32, #tpu.memory_space<vmem>>, vector<8x128xf32>
    %cst_9 = arith.constant 1.000000e+00 : f32
    %12 = vector.broadcast %cst_9 : f32 to vector<8x128xf32>
    %13 = arith.subf %12, %11 : vector<8x128xf32>
    %cst_10 = arith.constant 9.405000e-01 : f32
    %14 = vector.broadcast %cst_10 : f32 to vector<8x128xf32>
    %15 = arith.mulf %13, %14 : vector<8x128xf32>
    %16 = vector.extract_strided_slice %10 {offsets = [7, 0], sizes = [1, 128], strides = [1, 1]} : vector<8x128xf32> to vector<1x128xf32>
    %17 = vector.extract_strided_slice %15 {offsets = [7, 0], sizes = [1, 128], strides = [1, 1]} : vector<8x128xf32> to vector<1x128xf32>
    %18 = arith.mulf %17, %3 : vector<1x128xf32>
    %19 = arith.addf %16, %18 : vector<1x128xf32>
    %20 = vector.extract_strided_slice %10 {offsets = [6, 0], sizes = [1, 128], strides = [1, 1]} : vector<8x128xf32> to vector<1x128xf32>
    %21 = vector.extract_strided_slice %15 {offsets = [6, 0], sizes = [1, 128], strides = [1, 1]} : vector<8x128xf32> to vector<1x128xf32>
    %22 = arith.mulf %21, %19 : vector<1x128xf32>
    %23 = arith.addf %20, %22 : vector<1x128xf32>
    %24 = vector.extract_strided_slice %10 {offsets = [5, 0], sizes = [1, 128], strides = [1, 1]} : vector<8x128xf32> to vector<1x128xf32>
    %25 = vector.extract_strided_slice %15 {offsets = [5, 0], sizes = [1, 128], strides = [1, 1]} : vector<8x128xf32> to vector<1x128xf32>
    %26 = arith.mulf %25, %23 : vector<1x128xf32>
    %27 = arith.addf %24, %26 : vector<1x128xf32>
    %28 = vector.extract_strided_slice %10 {offsets = [4, 0], sizes = [1, 128], strides = [1, 1]} : vector<8x128xf32> to vector<1x128xf32>
    %29 = vector.extract_strided_slice %15 {offsets = [4, 0], sizes = [1, 128], strides = [1, 1]} : vector<8x128xf32> to vector<1x128xf32>
    %30 = arith.mulf %29, %27 : vector<1x128xf32>
    %31 = arith.addf %28, %30 : vector<1x128xf32>
    %32 = vector.extract_strided_slice %10 {offsets = [3, 0], sizes = [1, 128], strides = [1, 1]} : vector<8x128xf32> to vector<1x128xf32>
    %33 = vector.extract_strided_slice %15 {offsets = [3, 0], sizes = [1, 128], strides = [1, 1]} : vector<8x128xf32> to vector<1x128xf32>
    %34 = arith.mulf %33, %31 : vector<1x128xf32>
    %35 = arith.addf %32, %34 : vector<1x128xf32>
    %36 = vector.extract_strided_slice %10 {offsets = [2, 0], sizes = [1, 128], strides = [1, 1]} : vector<8x128xf32> to vector<1x128xf32>
    %37 = vector.extract_strided_slice %15 {offsets = [2, 0], sizes = [1, 128], strides = [1, 1]} : vector<8x128xf32> to vector<1x128xf32>
    %38 = arith.mulf %37, %35 : vector<1x128xf32>
    %39 = arith.addf %36, %38 : vector<1x128xf32>
    %40 = vector.extract_strided_slice %10 {offsets = [1, 0], sizes = [1, 128], strides = [1, 1]} : vector<8x128xf32> to vector<1x128xf32>
    %41 = vector.extract_strided_slice %15 {offsets = [1, 0], sizes = [1, 128], strides = [1, 1]} : vector<8x128xf32> to vector<1x128xf32>
    %42 = arith.mulf %41, %39 : vector<1x128xf32>
    %43 = arith.addf %40, %42 : vector<1x128xf32>
    %44 = vector.extract_strided_slice %10 {offsets = [0, 0], sizes = [1, 128], strides = [1, 1]} : vector<8x128xf32> to vector<1x128xf32>
    %45 = vector.extract_strided_slice %15 {offsets = [0, 0], sizes = [1, 128], strides = [1, 1]} : vector<8x128xf32> to vector<1x128xf32>
    %46 = arith.mulf %45, %43 : vector<1x128xf32>
    %47 = arith.addf %44, %46 : vector<1x128xf32>
    %48 = tpu.concatenate %47, %43, %39, %35, %31, %27, %23, %19 in 0 : vector<1x128xf32>, vector<1x128xf32>, vector<1x128xf32>, vector<1x128xf32>, vector<1x128xf32>, vector<1x128xf32>, vector<1x128xf32>, vector<1x128xf32> -> vector<8x128xf32>
    %c8_11 = arith.constant 8 : index
    %c0_12 = arith.constant 0 : index
    %49 = vector.load %arg6[%c8_11, %c0_12] : memref<16x128xf32, #tpu.memory_space<vmem>>, vector<8x128xf32>
    tpu.vector_store %arg6[%c8_11, %c0_12], %48 {strides = array<i32>} : memref<16x128xf32, #tpu.memory_space<vmem>>, vector<8x128xf32>,
    %c0_13 = arith.constant 0 : index
    %c0_14 = arith.constant 0 : index
    %50 = vector.load %arg4[%c0_13, %c0_14] : memref<16x128xf32, #tpu.memory_space<vmem>>, vector<8x128xf32>
    %c0_15 = arith.constant 0 : index
    %c0_16 = arith.constant 0 : index
    %51 = vector.load %arg3[%c0_15, %c0_16] : memref<16x128xf32, #tpu.memory_space<vmem>>, vector<8x128xf32>
    %cst_17 = arith.constant 9.900000e-01 : f32
    %52 = vector.broadcast %cst_17 : f32 to vector<8x128xf32>
    %53 = arith.mulf %52, %51 : vector<8x128xf32>
    %54 = arith.addf %50, %53 : vector<8x128xf32>
    %c0_18 = arith.constant 0 : index
    %c0_19 = arith.constant 0 : index
    %55 = vector.load %arg2[%c0_18, %c0_19] : memref<16x128xf32, #tpu.memory_space<vmem>>, vector<8x128xf32>
    %56 = arith.subf %54, %55 : vector<8x128xf32>
    %c0_20 = arith.constant 0 : index
    %c0_21 = arith.constant 0 : index
    %57 = vector.load %arg5[%c0_20, %c0_21] : memref<16x128xf32, #tpu.memory_space<vmem>>, vector<8x128xf32>
    %cst_22 = arith.constant 1.000000e+00 : f32
    %58 = vector.broadcast %cst_22 : f32 to vector<8x128xf32>
    %59 = arith.subf %58, %57 : vector<8x128xf32>
    %cst_23 = arith.constant 9.405000e-01 : f32
    %60 = vector.broadcast %cst_23 : f32 to vector<8x128xf32>
    %61 = arith.mulf %59, %60 : vector<8x128xf32>
    %62 = vector.extract_strided_slice %56 {offsets = [7, 0], sizes = [1, 128], strides = [1, 1]} : vector<8x128xf32> to vector<1x128xf32>
    %63 = vector.extract_strided_slice %61 {offsets = [7, 0], sizes = [1, 128], strides = [1, 1]} : vector<8x128xf32> to vector<1x128xf32>
    %64 = arith.mulf %63, %47 : vector<1x128xf32>
    %65 = arith.addf %62, %64 : vector<1x128xf32>
    %66 = vector.extract_strided_slice %56 {offsets = [6, 0], sizes = [1, 128], strides = [1, 1]} : vector<8x128xf32> to vector<1x128xf32>
    %67 = vector.extract_strided_slice %61 {offsets = [6, 0], sizes = [1, 128], strides = [1, 1]} : vector<8x128xf32> to vector<1x128xf32>
    %68 = arith.mulf %67, %65 : vector<1x128xf32>
    %69 = arith.addf %66, %68 : vector<1x128xf32>
    %70 = vector.extract_strided_slice %56 {offsets = [5, 0], sizes = [1, 128], strides = [1, 1]} : vector<8x128xf32> to vector<1x128xf32>
    %71 = vector.extract_strided_slice %61 {offsets = [5, 0], sizes = [1, 128], strides = [1, 1]} : vector<8x128xf32> to vector<1x128xf32>
    %72 = arith.mulf %71, %69 : vector<1x128xf32>
    %73 = arith.addf %70, %72 : vector<1x128xf32>
    %74 = vector.extract_strided_slice %56 {offsets = [4, 0], sizes = [1, 128], strides = [1, 1]} : vector<8x128xf32> to vector<1x128xf32>
    %75 = vector.extract_strided_slice %61 {offsets = [4, 0], sizes = [1, 128], strides = [1, 1]} : vector<8x128xf32> to vector<1x128xf32>
    %76 = arith.mulf %75, %73 : vector<1x128xf32>
    %77 = arith.addf %74, %76 : vector<1x128xf32>
    %78 = vector.extract_strided_slice %56 {offsets = [3, 0], sizes = [1, 128], strides = [1, 1]} : vector<8x128xf32> to vector<1x128xf32>
    %79 = vector.extract_strided_slice %61 {offsets = [3, 0], sizes = [1, 128], strides = [1, 1]} : vector<8x128xf32> to vector<1x128xf32>
    %80 = arith.mulf %79, %77 : vector<1x128xf32>
    %81 = arith.addf %78, %80 : vector<1x128xf32>
    %82 = vector.extract_strided_slice %56 {offsets = [2, 0], sizes = [1, 128], strides = [1, 1]} : vector<8x128xf32> to vector<1x128xf32>
    %83 = vector.extract_strided_slice %61 {offsets = [2, 0], sizes = [1, 128], strides = [1, 1]} : vector<8x128xf32> to vector<1x128xf32>
    %84 = arith.mulf %83, %81 : vector<1x128xf32>
    %85 = arith.addf %82, %84 : vector<1x128xf32>
    %86 = vector.extract_strided_slice %56 {offsets = [1, 0], sizes = [1, 128], strides = [1, 1]} : vector<8x128xf32> to vector<1x128xf32>
    %87 = vector.extract_strided_slice %61 {offsets = [1, 0], sizes = [1, 128], strides = [1, 1]} : vector<8x128xf32> to vector<1x128xf32>
    %88 = arith.mulf %87, %85 : vector<1x128xf32>
    %89 = arith.addf %86, %88 : vector<1x128xf32>
    %90 = vector.extract_strided_slice %56 {offsets = [0, 0], sizes = [1, 128], strides = [1, 1]} : vector<8x128xf32> to vector<1x128xf32>
    %91 = vector.extract_strided_slice %61 {offsets = [0, 0], sizes = [1, 128], strides = [1, 1]} : vector<8x128xf32> to vector<1x128xf32>
    %92 = arith.mulf %91, %89 : vector<1x128xf32>
    %93 = arith.addf %90, %92 : vector<1x128xf32>
    %94 = tpu.concatenate %93, %89, %85, %81, %77, %73, %69, %65 in 0 : vector<1x128xf32>, vector<1x128xf32>, vector<1x128xf32>, vector<1x128xf32>, vector<1x128xf32>, vector<1x128xf32>, vector<1x128xf32>, vector<1x128xf32> -> vector<8x128xf32>
    %c0_24 = arith.constant 0 : index
    %c0_25 = arith.constant 0 : index
    %95 = vector.load %arg6[%c0_24, %c0_25] : memref<16x128xf32, #tpu.memory_space<vmem>>, vector<8x128xf32>
    tpu.vector_store %arg6[%c0_24, %c0_25], %94 {strides = array<i32>} : memref<16x128xf32, #tpu.memory_space<vmem>>, vector<8x128xf32>,
    %c0_26 = arith.constant 0 : index
    %c0_27 = arith.constant 0 : index
    %96 = vector.load %arg7[%c0_26, %c0_27] : memref<1x128xf32, #tpu.memory_space<vmem>>, vector<1x128xf32>
    tpu.vector_store %arg7[%c0_26, %c0_27], %93 {strides = array<i32>} : memref<1x128xf32, #tpu.memory_space<vmem>>, vector<1x128xf32>,
    return
  }
  func.func @transform_0(%arg0: i32, %arg1: i32) -> (i32, i32) {
    %c0_i32 = arith.constant 0 : i32
    %0 = arith.subi %c0_i32, %arg1 : i32
    %c0_i32_0 = arith.constant 0 : i32
    return %0, %arg0 : i32, i32
  }
  func.func @transform_1(%arg0: i32, %arg1: i32) -> (i32, i32) {
    %c0_i32 = arith.constant 0 : i32
    %0 = arith.subi %c0_i32, %arg1 : i32
    %c0_i32_0 = arith.constant 0 : i32
    return %0, %arg0 : i32, i32
  }
  func.func @transform_2(%arg0: i32, %arg1: i32) -> (i32, i32) {
    %c0_i32 = arith.constant 0 : i32
    %0 = arith.subi %c0_i32, %arg1 : i32
    %c0_i32_0 = arith.constant 0 : i32
    return %0, %arg0 : i32, i32
  }
  func.func @transform_3(%arg0: i32, %arg1: i32) -> (i32, i32) {
    %c0_i32 = arith.constant 0 : i32
    %0 = arith.subi %c0_i32, %arg1 : i32
    %c0_i32_0 = arith.constant 0 : i32
    return %0, %arg0 : i32, i32
  }
  func.func @transform_4(%arg0: i32, %arg1: i32) -> (i32, i32) {
    %c0_i32 = arith.constant 0 : i32
    %0 = arith.subi %c0_i32, %arg1 : i32
    %c0_i32_0 = arith.constant 0 : i32
    return %0, %arg0 : i32, i32
  }
}

</mosaic_0001>

<bundles_post_ra>
// kernel: tpu_custom_call.1
= control target key start
LH: loop header
LB: loop body
LE: loop exit
PB: predicated region body
PF: predicated region fallthrough
CT: control target
= control target key end

     0   :  { %9 = vsyncpa [#allocation4], 0  ;;  %s457_s0 = inlined_call_operand.hbm [shape: f32[16,128], index: 0, kind: input, shape index: {}]   ;;  %s458_s1 = inlined_call_operand.hbm [shape: f32[16,128], index: 1, kind: input, shape index: {}]   ;;  %s459_s2 = inlined_call_operand.hbm [shape: f32[16,128], index: 2, kind: input, shape index: {}]   ;;  %s460_s3 = inlined_call_operand.hbm [shape: f32[16,128], index: 3, kind: input, shape index: {}]   ;;  %s461_s4 = inlined_call_operand.hbm [shape: f32[16,128], index: 4, kind: output, shape index: {}]  }
   0x1   :  { %10 = vsyncpa [#allocation7], 0 }
   0x2   :  { %11 = vsyncpa [#allocation10], 0 }
   0x3   :  { %12 = vsyncpa [#allocation5], 0  ;;  %s380_s15 = smov [#allocation6]   ;;  %s381_s17 = smov [#allocation3]  }
   0x4   :  { %s38_s16 = sshll.u32 %s380_s15, 4  ;;  %s22_s18 = sshll.u32 %s381_s17, 4  ;;  %s39_s16 = int_to_ptr.vmem [resolvable:$true] %s38_s16  ;;  %s23_s18 = int_to_ptr.vmem [resolvable:$true] %s22_s18 }
   0x5   :  { %s280_s19 = scalar_lea.vmem %s39_s16, 256  ;;  %p285_p1 = scmp.lt.s32.totalorder %s39_s16, %s39_s16 }
   0x6   :  { %p281_p0 = scmp.ne.s32.totalorder %s39_s16, %s280_s19  ;;  %p286_p2 = scmp.lt.s32.totalorder %s280_s19, %s280_s19 }
   0x8   :  { %p287_p3 = por %p286_p2, %p285_p1 }
   0xa   :  { %p288_p4 = pnand %p287_p3, %p281_p0 }
   0xc   :  { %291 = shalt.err (!%p288_p4)
}
   0xd   :  { %s382_s20 = smov 128   ;;  %s383_s21 = smov 8  }
   0xe   :  { %44 = dma.hbm_to_vmem [thread:$0]  %s458_s1, 256, %s39_s16, [#allocation7], %s382_s20, %s382_s20, %s383_s21  }
   0xf   :  { %s300_s24 = scalar_lea.vmem %s23_s18, 256  ;;  %p305_p6 = scmp.lt.s32.totalorder %s23_s18, %s23_s18 }
  0x10   :  { %p301_p5 = scmp.ne.s32.totalorder %s23_s18, %s300_s24  ;;  %p306_p7 = scmp.lt.s32.totalorder %s300_s24, %s300_s24 }
  0x12   :  { %p307_p8 = por %p306_p7, %p305_p6 }
  0x14   :  { %p308_p9 = pnand %p307_p8, %p301_p5 }
  0x16   :  { %311 = shalt.err (!%p308_p9)
}
  0x17   :  { %28 = dma.hbm_to_vmem [thread:$0]  %s457_s0, 256, %s23_s18, [#allocation4], %s382_s20, %s382_s20, %s383_s21  }
  0x18   :  { %s384_s27 = smov [#allocation8]   ;;  %s385_s29 = smov [#allocation9]  }
  0x19   :  { %s54_s28 = sshll.u32 %s384_s27, 4  ;;  %s70_s30 = sshll.u32 %s385_s29, 4  ;;  %s55_s28 = int_to_ptr.vmem [resolvable:$true] %s54_s28  ;;  %s71_s30 = int_to_ptr.vmem [resolvable:$true] %s70_s30 }
  0x1a   :  { %s320_s1 = scalar_lea.vmem %s55_s28, 256  ;;  %p325_p11 = scmp.lt.s32.totalorder %s55_s28, %s55_s28 }
  0x1b   :  { %p321_p10 = scmp.ne.s32.totalorder %s55_s28, %s320_s1  ;;  %p326_p12 = scmp.lt.s32.totalorder %s320_s1, %s320_s1 }
  0x1d   :  { %p327_p13 = por %p326_p12, %p325_p11 }
  0x1f   :  { %p328_p0 = pnand %p327_p13, %p321_p10 }
  0x21   :  { %331 = shalt.err (!%p328_p0)
}
  0x22   :  { %60 = dma.hbm_to_vmem [thread:$0]  %s459_s2, 256, %s55_s28, [#allocation7], %s382_s20, %s382_s20, %s383_s21  }
  0x23   :  { %s340_s0 = scalar_lea.vmem %s71_s30, 256  ;;  %p345_p2 = scmp.lt.s32.totalorder %s71_s30, %s71_s30 }
  0x24   :  { %p341_p1 = scmp.ne.s32.totalorder %s71_s30, %s340_s0  ;;  %p346_p3 = scmp.lt.s32.totalorder %s340_s0, %s340_s0 }
  0x26   :  { %p347_p4 = por %p346_p3, %p345_p2 }
  0x28   :  { %p348_p5 = pnand %p347_p4, %p341_p1 }
  0x2a   :  { %351 = shalt.err (!%p348_p5)
}
  0x2b   :  { %76 = dma.hbm_to_vmem [thread:$0]  %s460_s3, 256, %s71_s30, [#allocation10], %s382_s20, %s382_s20, %s383_s21  }
  0x2c   :  { %372 = dma.done.wait [#allocation4], 256  }
  0x2d   :  { %373 = vsyncadd [#allocation4], 4294967040 }
  0x2e   :  { %374 = dma.done.wait [#allocation7], 512  }
  0x2f   :  { %375 = vsyncadd [#allocation7], 4294966784 }
  0x30   :  { %376 = dma.done.wait [#allocation10], 256  }
  0x31   :  { %377 = vsyncadd [#allocation10], 4294967040  ;;  %v386_v0 = vmov 0.0   ;;  %v105_v1 = vld [vmem:[#allocation8 + $0x8] sm:$0xff]  ;;  %v106_v2 = vld [vmem:[#allocation6 + $0x8] sm:$0xff]  ;;  %vm157_vm0 = vcmask 1040384  }
  0x32   :  { %103 = vst [vmem:[#allocation2] sm:$0x1] %v386_v0  ;;  %v107_v3 = vmul.f32 0.99, %v106_v2  ;;  %v111_v4 = vld [vmem:[#allocation9 + $0x8] sm:$0xff]  ;;  %v109_v5 = vld [vmem:[#allocation3 + $0x8] sm:$0xff] }
  0x33   :  { %v112_v6 = vsub.f32 1.0, %v111_v4  ;;  %v173_v29 = vld [vmem:[#allocation6] sm:$0xff]  ;;  %v172_v34 = vld [vmem:[#allocation8] sm:$0xff]  ;;  %vm159_vm1 = vcmask 1041408   ;;  %vm161_vm2 = vcmask 1042432   ;;  %vm163_vm3 = vcmask 1043456  }
  0x34   :  { %v108_v8 = vadd.f32 %v107_v3, %v105_v1  ;;  %v178_v31 = vld [vmem:[#allocation9] sm:$0xff]  ;;  %v174_v33 = vmul.f32 0.99, %v173_v29  ;;  %v176_v39 = vld [vmem:[#allocation3] sm:$0xff]  ;;  %vm165_vm4 = vcmask 1044480   ;;  %vm167_vm5 = vcmask 1045504  }
  0x35   :  { %v113_v9 = vmul.f32 0.9405, %v112_v6  ;;  %v179_v36 = vsub.f32 1.0, %v178_v31  ;;  %vm169_vm6 = vcmask 1046528   ;;  %s387_s2 = smov [#allocation11]  }
  0x36   :  { %v110_v10 = vsub.f32 %v108_v8, %v109_v5  ;;  %v175_v38 = vadd.f32 %v174_v33, %v172_v34  ;;  %s239_s3 = sshll.u32 %s387_s2, 4  ;;  %s240_s3 = int_to_ptr.vmem [resolvable:$true] %s239_s3 }
  0x37   :  { %v180_v41 = vmul.f32 0.9405, %v179_v36  ;;  %s352_s9 = scalar_lea.vmem %s240_s3, 256  ;;  %p357_p7 = scmp.lt.s32.totalorder %s240_s3, %s240_s3 }
  0x38   :  { %v177_v43 = vsub.f32 %v175_v38, %v176_v39  ;;  %p353_p6 = scmp.ne.s32.totalorder %s240_s3, %s352_s9  ;;  %p358_p8 = scmp.lt.s32.totalorder %s352_s9, %s352_s9 }
  0x39   :  { %v263_v7 = vld [vmem:[#allocation2] ss:$0 sm:$0xff] }
  0x3a   :  { %v120_v11 = vmul.f32 %v263_v7, %v113_v9  ;;  %p359_p9 = por %p358_p8, %p357_p7 }
  0x3c   :  { %v121_v12 = vadd.f32 %v120_v11, %v110_v10  ;;  %p360_p10 = pnand %p359_p9, %p353_p6 }
  0x3e   :  { %v123_v13 = vrot.slane %v121_v12, 1 }
  0x40   :  { %v125_v14 = vmul.f32 %v123_v13, %v113_v9 }
  0x42   :  { %v126_v15 = vadd.f32 %v125_v14, %v110_v10 }
  0x44   :  { %v128_v16 = vrot.slane %v126_v15, 1 }
  0x46   :  { %v130_v17 = vmul.f32 %v128_v16, %v113_v9 }
  0x48   :  { %v131_v18 = vadd.f32 %v130_v17, %v110_v10 }
  0x4a   :  { %v133_v19 = vrot.slane %v131_v18, 1 }
  0x4c   :  { %v135_v20 = vmul.f32 %v133_v19, %v113_v9 }
  0x4e   :  { %v136_v21 = vadd.f32 %v135_v20, %v110_v10 }
  0x50   :  { %v138_v22 = vrot.slane %v136_v21, 1 }
  0x52   :  { %v140_v23 = vmul.f32 %v138_v22, %v113_v9 }
  0x54   :  { %v141_v24 = vadd.f32 %v140_v23, %v110_v10 }
  0x56   :  { %v143_v25 = vrot.slane %v141_v24, 1 }
  0x58   :  { %v145_v26 = vmul.f32 %v143_v25, %v113_v9 }
  0x5a   :  { %v146_v27 = vadd.f32 %v145_v26, %v110_v10 }
  0x5c   :  { %v148_v28 = vrot.slane %v146_v27, 1 }
  0x5e   :  { %v150_v30 = vmul.f32 %v148_v28, %v113_v9 }
  0x60   :  { %v151_v32 = vadd.f32 %v150_v30, %v110_v10 }
  0x62   :  { %v153_v35 = vrot.slane %v151_v32, 1 }
  0x64   :  { %v155_v37 = vmul.f32 %v153_v35, %v113_v9 }
  0x66   :  { %v156_v40 = vadd.f32 %v155_v37, %v110_v10 }
  0x68   :  { %v158_v42 = vsel %vm157_vm0, %v156_v40, %v151_v32  ;;  %v182_v44 = vrot.slane %v156_v40, 1 }
  0x69   :  { %v160_v45 = vsel %vm159_vm1, %v158_v42, %v146_v27 }
  0x6a   :  { %v162_v46 = vsel %vm161_vm2, %v160_v45, %v141_v24  ;;  %v184_v47 = vmul.f32 %v182_v44, %v180_v41 }
  0x6b   :  { %v164_v48 = vsel %vm163_vm3, %v162_v46, %v136_v21 }
  0x6c   :  { %v166_v49 = vsel %vm165_vm4, %v164_v48, %v131_v18  ;;  %v185_v50 = vadd.f32 %v184_v47, %v177_v43 }
  0x6d   :  { %v168_v51 = vsel %vm167_vm5, %v166_v49, %v126_v15 }
  0x6e   :  { %v170_v52 = vsel %vm169_vm6, %v168_v51, %v121_v12  ;;  %v187_v53 = vrot.slane %v185_v50, 1 }
  0x6f   :  { %171 = vst [vmem:[#allocation11 + $0x8] sm:$0xff] %v170_v52 }
  0x70   :  { %v189_v54 = vmul.f32 %v187_v53, %v180_v41 }
  0x72   :  { %v190_v55 = vadd.f32 %v189_v54, %v177_v43 }
  0x74   :  { %v192_v56 = vrot.slane %v190_v55, 1 }
  0x76   :  { %v194_v57 = vmul.f32 %v192_v56, %v180_v41 }
  0x78   :  { %v195_v58 = vadd.f32 %v194_v57, %v177_v43 }
  0x7a   :  { %v197_v59 = vrot.slane %v195_v58, 1 }
  0x7c   :  { %v199_v60 = vmul.f32 %v197_v59, %v180_v41 }
  0x7e   :  { %v200_v61 = vadd.f32 %v199_v60, %v177_v43 }
  0x80   :  { %v202_v62 = vrot.slane %v200_v61, 1 }
  0x82   :  { %v204_v63 = vmul.f32 %v202_v62, %v180_v41 }
  0x84   :  { %v205_v0 = vadd.f32 %v204_v63, %v177_v43 }
  0x86   :  { %v207_v1 = vrot.slane %v205_v0, 1 }
  0x88   :  { %v209_v2 = vmul.f32 %v207_v1, %v180_v41 }
  0x8a   :  { %v210_v3 = vadd.f32 %v209_v2, %v177_v43 }
  0x8c   :  { %v212_v4 = vrot.slane %v210_v3, 1 }
  0x8e   :  { %v214_v5 = vmul.f32 %v212_v4, %v180_v41 }
  0x90   :  { %v215_v6 = vadd.f32 %v214_v5, %v177_v43 }
  0x92   :  { %v217_v7 = vrot.slane %v215_v6, 1 }
  0x94   :  { %v219_v8 = vmul.f32 %v217_v7, %v180_v41 }
  0x96   :  { %v220_v9 = vadd.f32 %v219_v8, %v177_v43 }
  0x98   :  { %v221_v10 = vsel %vm157_vm0, %v220_v9, %v215_v6  ;;  %229 = vst [vmem:[#allocation2] sm:$0x1] %v220_v9 }
  0x99   :  { %v222_v11 = vsel %vm159_vm1, %v221_v10, %v210_v3 }
  0x9a   :  { %v223_v12 = vsel %vm161_vm2, %v222_v11, %v205_v0 }
  0x9b   :  { %v224_v13 = vsel %vm163_vm3, %v223_v12, %v200_v61 }
  0x9c   :  { %v225_v14 = vsel %vm165_vm4, %v224_v13, %v195_v58 }
  0x9d   :  { %v226_v15 = vsel %vm167_vm5, %v225_v14, %v190_v55 }
  0x9e   :  { %v227_v16 = vsel %vm169_vm6, %v226_v15, %v185_v50 }
  0x9f   :  { %228 = vst [vmem:[#allocation11] sm:$0xff] %v227_v16 }
  0xa0   :  { %363 = shalt.err (!%p360_p10)
}
  0xa1   :  { %245 = dma.vmem_to_hbm [thread:$0]  %s240_s3, 256, %s461_s4, [#allocation5], %s382_s20, %s382_s20, %s383_s21  }
  0xa2   :  { %378 = dma.done.wait [#allocation5], 256  }
  0xa3   :  { %379 = vsyncadd [#allocation5], 4294967040 }
  0xa4   :  { %249 = vsyncpa [#allocation4], 1 }
  0xa5   :  { %250 = vsyncpa [#allocation7], 1 }
  0xa6   :  { %251 = vsyncpa [#allocation10], 1 }
  0xa7   :  { %252 = vsyncpa [#allocation5], 1 }

</bundles_post_ra>
